<compile_context>
chip_gen: v7x
topology: tpu7x:2x2x1
jax: 0.10.0
libtpu: 0.0.40
codegen_flags: <defaults>
</compile_context>

<pallas_src>
import math
import functools

import jax
import jax.numpy as jnp
from jax import lax
from jax.experimental import pallas as pl
from jax.experimental.pallas import tpu as pltpu


def _fast_recip(x):
    # EUP-seeded reciprocal + 2 Newton refinements: keeps the divide off the
    # VALU slot while staying ~f32-accurate (the b=2 / eps=1e-5 BatchNorm can
    # amplify softmax-weight noise by up to 1/sqrt(eps) at degenerate features,
    # so the raw approx result alone is not safe at the 2e-3 tolerance).
    r = pl.reciprocal(x, approx=True)
    r = r * (2.0 - x * r)
    r = r * (2.0 - x * r)
    return r


def _batchnorm_groups(groups, gamma, beta, eps):
    # BatchNorm1d(C*D) in training mode over a list of per-batch-sample (C, D)
    # activations: batch statistics, biased variance.
    inv_b = 1.0 / len(groups)
    mean = groups[0]
    for o in groups[1:]:
        mean = mean + o
    mean = mean * inv_b
    var = (groups[0] - mean) * (groups[0] - mean)
    for o in groups[1:]:
        var = var + (o - mean) * (o - mean)
    var = var * inv_b
    inv_std = lax.rsqrt(var + eps)
    return [(o - mean) * inv_std * gamma + beta for o in groups]


def _pma_kernel(x_ref, wkv_ref, bkv_ref, mu_ref, nhi_ref, gc_ref,
                seldh_ref, selhd_ref, wo_ref, bo_ref,
                g0_ref, be0_ref, g1_ref, be1_ref, o_ref,
                *, batch, n_sets):
    f32 = jnp.float32
    eps = 1e-5
    D = x_ref.shape[1]                       # dim (lane axis)
    C = mu_ref.shape[0]                      # num_caps (== num_seeds)
    nC = n_sets * C
    scale = 1.0 / math.sqrt(float(D))

    # ---- fused K/V projection with COMPACT (D, 2D) weights -------------------
    x = x_ref[...]                                                    # (b*n*C, D)
    kv = jnp.dot(x, wkv_ref[...], preferred_element_type=f32) + bkv_ref[...]
    K = kv[:, :D]                                                     # (b*n*C, D)
    V = kv[:, D:]                                                     # (b*n*C, D)

    # ---- per-capsule Gaussian constants (precomputed in packing), tiled ------
    reps = batch * n_sets
    mu_t = jnp.concatenate([mu_ref[...]] * reps, axis=0)              # (b*n*C, D)
    nhi_t = jnp.concatenate([nhi_ref[...]] * reps, axis=0)
    gc_t = jnp.concatenate([gc_ref[...]] * reps, axis=0)

    diff = K - mu_t
    T = diff * diff * nhi_t + gc_t                                    # (b*n*C, D)

    # ---- per-head reduction over each head's ds lanes (tiny MXU matmul) ------
    ll = jnp.dot(T, seldh_ref[...], preferred_element_type=f32) * scale  # (b*n*C, H)

    # ---- softmax over n_sets within each batch group (static slices; --------
    # ---- O(b*n) memory/VALU, no masked (b, b*n, *) tensor, no -inf) ----------
    a_parts = []
    for g in range(batch):
        base = g * nC
        blocks = [ll[base + j * C: base + (j + 1) * C, :] for j in range(n_sets)]
        mx = blocks[0]
        for blk in blocks[1:]:
            mx = jnp.maximum(mx, blk)
        e_blocks = [jnp.exp(blk - mx) for blk in blocks]
        den = e_blocks[0]
        for e in e_blocks[1:]:
            den = den + e
        inv_den = _fast_recip(den)
        a_parts.extend([e * inv_den for e in e_blocks])
    A = jnp.concatenate(a_parts, axis=0)                              # (b*n*C, H)

    # ---- expand head weights back to feature lanes, weight V, sum over n -----
    a_exp = jnp.dot(A, selhd_ref[...], preferred_element_type=f32)    # (b*n*C, D)
    wv = a_exp * V
    o_groups = []
    for g in range(batch):
        base = g * nC
        s = wv[base: base + C, :]
        for j in range(1, n_sets):
            s = s + wv[base + j * C: base + (j + 1) * C, :]
        o_groups.append(mu_ref[...] + s)                              # (C, D)

    # ---- ln0: BatchNorm1d(C*D), training mode (batch stats, biased var) ------
    o_groups = _batchnorm_groups(o_groups, g0_ref[...], be0_ref[...], eps)

    # ---- O = O + relu(fc_o(O)) with the compact (D, D) weight ----------------
    o_stack = jnp.concatenate(o_groups, axis=0)                       # (b*C, D)
    fc = jnp.dot(o_stack, wo_ref[...], preferred_element_type=f32) + bo_ref[...]
    o_stack = o_stack + jnp.maximum(fc, 0.0)
    o_groups = [o_stack[g * C:(g + 1) * C, :] for g in range(batch)]

    # ---- ln1 ------------------------------------------------------------------
    o_groups = _batchnorm_groups(o_groups, g1_ref[...], be1_ref[...], eps)

    o_ref[...] = jnp.concatenate(o_groups, axis=0).astype(o_ref.dtype)   # (b*C, D)


def pack_pma_params(params, num_heads):
    """Build the kernel's constant operands ONCE per parameter set.

    Pure parameter-only work (weight fusion, softplus / log-softmax folding,
    head selectors) lives here, not in the per-call forward: the forward does
    no packing and writes no freshly materialized weights to HBM."""
    (WkT, bk, WvT, bv, M, S, p, WoT, bo, g0, be0, g1, be1) = params
    C, D = M.shape
    ds = D // num_heads
    f32 = jnp.float32

    wkv = jnp.concatenate([WkT, WvT], axis=1).astype(f32)            # (D, 2D)
    bkv = jnp.concatenate([bk, bv], axis=1).astype(f32)              # (1, 2D)

    sigma = jax.nn.softplus(S)                                       # (C, D)
    nhi = -0.5 / (sigma * sigma)                                     # (C, D)
    logp = jax.nn.log_softmax(p, axis=-1)                            # (1, C)
    gconst = (-0.5 * math.log(2.0 * math.pi) - jnp.log(sigma)
              + logp[0][:, None] / ds)                               # (C, D)

    d_idx = jnp.arange(D)
    h_idx = jnp.arange(num_heads)
    sel_dh = (d_idx[:, None] // ds == h_idx[None, :]).astype(f32)    # (D, H)
    sel_hd = sel_dh.T                                                # (H, D)

    # NOTE: with the block-diagonal blow-up removed, the weights/selectors here
    # total ~12 KiB; casting them to bf16 would save ~6 KiB of DMA but adds
    # ~2e-3 relative weight rounding that the b=2/eps=1e-5 BatchNorm can
    # amplify past the validation tolerance, so they intentionally stay f32.
    return (wkv, bkv, M.astype(f32), nhi.astype(f32), gconst.astype(f32),
            sel_dh, sel_hd, WoT.astype(f32), bo.astype(f32),
            g0.astype(f32), be0.astype(f32), g1.astype(f32), be1.astype(f32))


def pma_forward(X, packed, num_heads):
    """Per-call forward: only reshapes X and launches the Pallas kernel."""
    b, n, C, D = X.shape
    H = num_heads
    x2 = X.reshape(b * n * C, D).astype(jnp.float32)     # contiguous, no transpose
    inputs = (x2,) + tuple(packed)

    R3 = b * n * C
    flops = int(2 * R3 * D * (2 * D)          # fused K/V projection
                + 2 * R3 * D * H              # per-head log-likelihood reduction
                + 2 * R3 * H * D              # head -> feature expansion
                + 2 * (b * C) * D * D         # fc_o
                + 30 * R3 * D)                # elementwise (Gaussian, softmax, BN)
    transcendentals = int(R3 * H + b * C * H + 4 * b * C * D)
    bytes_accessed = int(sum(int(a.size) * a.dtype.itemsize for a in inputs)
                         + b * C * D * 4)

    kern = functools.partial(_pma_kernel, batch=b, n_sets=n)

    # Gridless whole-problem kernel: the BatchNorm couples the entire batch and
    # all operands fit in a few KiB of VMEM.  At production b*n, grid the row
    # axis ("parallel") for projection/log-likelihood/softmax-exp with weights
    # resident via constant index_maps, and run the batch-coupled BN + fc_o
    # epilogue on a final "arbitrary" step (or a second tiny pallas_call) so
    # DMA pipelines and v7x's second TensorCore engages.
    out = pl.pallas_call(
        kern,
        out_shape=jax.ShapeDtypeStruct((b * C, D), jnp.float32),
        in_specs=[pl.BlockSpec(memory_space=pltpu.MemorySpace.VMEM)
                  for _ in inputs],
        out_specs=pl.BlockSpec(memory_space=pltpu.MemorySpace.VMEM),
        compiler_params=pltpu.CompilerParams(vmem_limit_bytes=32 * 1024 * 1024),
        cost_estimate=pl.CostEstimate(flops=flops,
                                      transcendentals=transcendentals,
                                      bytes_accessed=bytes_accessed),
    )(*inputs)
    return out.reshape(b, C, D)


def pma_reference(X, params, num_heads):
    """Pure-JAX mirror of the PyTorch forward (correctness check)."""
    (WkT, bk, WvT, bv, M, S, p, WoT, bo, g0, be0, g1, be1) = params
    b, n, C, D = X.shape
    ds = D // num_heads
    eps = 1e-5

    K = jnp.einsum('bncd,de->bnce', X, WkT) + bk[0]
    V = jnp.einsum('bncd,de->bnce', X, WvT) + bv[0]
    sigma = jax.nn.softplus(S)
    pr = jax.nn.softmax(p, axis=-1)                      # (1, C)

    heads = []
    for h in range(num_heads):
        sl = slice(h * ds, (h + 1) * ds)
        Kh, Vh, Mh, Sh = K[..., sl], V[..., sl], M[:, sl], sigma[:, sl]
        diff = Kh - Mh[None, None]
        ll = jnp.sum(-0.5 * jnp.log(2 * jnp.pi) - jnp.log(Sh)[None, None]
                     - 0.5 * diff ** 2 / Sh[None, None] ** 2, axis=-1)
        ll = ll + jnp.log(pr)[0][None, None, :]
        A = jax.nn.softmax(ll / jnp.sqrt(float(D)), axis=1)
        heads.append(Mh[None] + jnp.sum(A[..., None] * Vh, axis=1))
    O = jnp.concatenate(heads, axis=-1)

    def bn(x, g, bb):
        m = x.mean(0, keepdims=True)
        v = ((x - m) ** 2).mean(0, keepdims=True)
        return (x - m) / jnp.sqrt(v + eps) * g[None] + bb[None]

    O = bn(O, g0, be0)
    O = O + jax.nn.relu(jnp.einsum('bcd,de->bce', O, WoT) + bo[0])
    O = bn(O, g1, be1)
    return O


def init_params(key, dim, num_seeds):
    ks = jax.random.split(key, 9)

    def unif(k, shape, fan_in):
        bound = math.sqrt(1.0 / fan_in)
        return jax.random.uniform(k, shape, jnp.float32, -bound, bound)

    M = jax.random.normal(ks[0], (num_seeds, dim), jnp.float32) * math.sqrt(2.0 / dim)
    S = jax.random.normal(ks[1], (num_seeds, dim), jnp.float32) * math.sqrt(2.0 / dim)
    p = jax.random.normal(ks[2], (1, num_seeds), jnp.float32) * 0.5
    WkT = unif(ks[3], (dim, dim), dim)               # (in, out)
    bk = unif(ks[4], (1, dim), dim)
    WvT = unif(ks[5], (dim, dim), dim)
    bv = unif(ks[6], (1, dim), dim)
    WoT = unif(ks[7], (dim, dim), dim)
    bo = unif(ks[8], (1, dim), dim)
    g0 = jnp.ones((num_seeds, dim), jnp.float32)     # BatchNorm1d weight / bias
    be0 = jnp.zeros((num_seeds, dim), jnp.float32)
    g1 = jnp.ones((num_seeds, dim), jnp.float32)
    be1 = jnp.zeros((num_seeds, dim), jnp.float32)
    # TODO(synk): BatchNorm running-mean/var buffer updates (a training-time
    # side effect of the PyTorch module) are not materialized; only the
    # normalization math is.
    return (WkT, bk, WvT, bv, M, S, p, WoT, bo, g0, be0, g1, be1)


if __name__ == "__main__":
    batch, n_sets, num_caps, dim = 2, 4, 8, 32
    num_heads = 4
    num_seeds = num_caps   # required by the PyTorch forward's broadcasting

    key = jax.random.PRNGKey(0)
    kx, kp = jax.random.split(key)
    X = jax.random.normal(kx, (batch, n_sets, num_caps, dim), jnp.float32)
    params = init_params(kp, dim, num_seeds)

    # Packing is hoisted: built once per parameter set, reused by every forward.
    packed = pack_pma_params(params, num_heads)

    out = pma_forward(X, packed, num_heads)
    out = jax.block_until_ready(out)

    ref = jax.block_until_ready(pma_reference(X, params, num_heads))
    assert out.shape == (batch, num_caps, dim)
    # Tolerance note: the kernel is an algebraically identical but reordered
    # computation (fused compact matmuls, parameter constants folded at pack
    # time, Newton-refined EUP reciprocal); the b=2 BatchNorm with eps=1e-5 can
    # amplify f32 reordering noise by ~1/sqrt(eps) at near-degenerate features,
    # so compare at 2e-3.
    err = float(jnp.max(jnp.abs(out - ref)))
    assert jnp.allclose(out, ref, rtol=2e-3, atol=2e-3), \
        f"mismatch vs JAX reference (max abs err {err})"

    print("KERNEL_OK")
</pallas_src>

<mosaic_0001>
module attributes {stable_mosaic.version = 11 : i64} {
  func.func @_pma_kernel(%arg0: memref<64x32xf32, #tpu.memory_space<vmem>>, %arg1: memref<32x64xf32, #tpu.memory_space<vmem>>, %arg2: memref<1x64xf32, #tpu.memory_space<vmem>>, %arg3: memref<8x32xf32, #tpu.memory_space<vmem>>, %arg4: memref<8x32xf32, #tpu.memory_space<vmem>>, %arg5: memref<8x32xf32, #tpu.memory_space<vmem>>, %arg6: memref<32x4xf32, #tpu.memory_space<vmem>>, %arg7: memref<4x32xf32, #tpu.memory_space<vmem>>, %arg8: memref<32x32xf32, #tpu.memory_space<vmem>>, %arg9: memref<1x32xf32, #tpu.memory_space<vmem>>, %arg10: memref<8x32xf32, #tpu.memory_space<vmem>>, %arg11: memref<8x32xf32, #tpu.memory_space<vmem>>, %arg12: memref<8x32xf32, #tpu.memory_space<vmem>>, %arg13: memref<8x32xf32, #tpu.memory_space<vmem>>, %arg14: memref<16x32xf32, #tpu.memory_space<vmem>>) attributes {dimension_semantics = [], scalar_prefetch = 0 : i64, scratch_operands = 0 : i64, tpu.core_type = #tpu.core_type<tc>} {
    %c0 = arith.constant 0 : index
    %c0_0 = arith.constant 0 : index
    %0 = vector.load %arg0[%c0, %c0_0] : memref<64x32xf32, #tpu.memory_space<vmem>>, vector<64x32xf32>
    %c0_1 = arith.constant 0 : index
    %c0_2 = arith.constant 0 : index
    %1 = vector.load %arg1[%c0_1, %c0_2] : memref<32x64xf32, #tpu.memory_space<vmem>>, vector<32x64xf32>
    %cst = arith.constant dense<0.000000e+00> : vector<64x64xf32>
    %2 = tpu.matmul %0, %1, %cst {dimension_numbers = #tpu.dot_dimension_numbers<[1], [0], [0], [1], [0, 0, 1, 1], [], []>} : vector<64x32xf32>, vector<32x64xf32>, vector<64x64xf32> -> vector<64x64xf32>
    %c0_3 = arith.constant 0 : index
    %c0_4 = arith.constant 0 : index
    %3 = vector.load %arg2[%c0_3, %c0_4] : memref<1x64xf32, #tpu.memory_space<vmem>>, vector<1x64xf32>
    %4 = vector.broadcast %3 : vector<1x64xf32> to vector<64x64xf32>
    %5 = arith.addf %2, %4 : vector<64x64xf32>
    %6 = vector.extract_strided_slice %5 {offsets = [0, 0], sizes = [64, 32], strides = [1, 1]} : vector<64x64xf32> to vector<64x32xf32>
    %7 = vector.extract_strided_slice %5 {offsets = [0, 32], sizes = [64, 32], strides = [1, 1]} : vector<64x64xf32> to vector<64x32xf32>
    %c0_5 = arith.constant 0 : index
    %c0_6 = arith.constant 0 : index
    %8 = vector.load %arg3[%c0_5, %c0_6] : memref<8x32xf32, #tpu.memory_space<vmem>>, vector<8x32xf32>
    %9 = tpu.concatenate %8, %8, %8, %8, %8, %8, %8, %8 in 0 : vector<8x32xf32>, vector<8x32xf32>, vector<8x32xf32>, vector<8x32xf32>, vector<8x32xf32>, vector<8x32xf32>, vector<8x32xf32>, vector<8x32xf32> -> vector<64x32xf32>
    %c0_7 = arith.constant 0 : index
    %c0_8 = arith.constant 0 : index
    %10 = vector.load %arg4[%c0_7, %c0_8] : memref<8x32xf32, #tpu.memory_space<vmem>>, vector<8x32xf32>
    %11 = tpu.concatenate %10, %10, %10, %10, %10, %10, %10, %10 in 0 : vector<8x32xf32>, vector<8x32xf32>, vector<8x32xf32>, vector<8x32xf32>, vector<8x32xf32>, vector<8x32xf32>, vector<8x32xf32>, vector<8x32xf32> -> vector<64x32xf32>
    %c0_9 = arith.constant 0 : index
    %c0_10 = arith.constant 0 : index
    %12 = vector.load %arg5[%c0_9, %c0_10] : memref<8x32xf32, #tpu.memory_space<vmem>>, vector<8x32xf32>
    %13 = tpu.concatenate %12, %12, %12, %12, %12, %12, %12, %12 in 0 : vector<8x32xf32>, vector<8x32xf32>, vector<8x32xf32>, vector<8x32xf32>, vector<8x32xf32>, vector<8x32xf32>, vector<8x32xf32>, vector<8x32xf32> -> vector<64x32xf32>
    %14 = arith.subf %6, %9 : vector<64x32xf32>
    %15 = arith.mulf %14, %14 : vector<64x32xf32>
    %16 = arith.mulf %15, %11 : vector<64x32xf32>
    %17 = arith.addf %16, %13 : vector<64x32xf32>
    %c0_11 = arith.constant 0 : index
    %c0_12 = arith.constant 0 : index
    %18 = vector.load %arg6[%c0_11, %c0_12] : memref<32x4xf32, #tpu.memory_space<vmem>>, vector<32x4xf32>
    %cst_13 = arith.constant dense<0.000000e+00> : vector<64x4xf32>
    %19 = tpu.matmul %17, %18, %cst_13 {dimension_numbers = #tpu.dot_dimension_numbers<[1], [0], [0], [1], [0, 0, 1, 1], [], []>} : vector<64x32xf32>, vector<32x4xf32>, vector<64x4xf32> -> vector<64x4xf32>
    %cst_14 = arith.constant 0.176776692 : f32
    %20 = vector.broadcast %cst_14 : f32 to vector<64x4xf32>
    %21 = arith.mulf %19, %20 : vector<64x4xf32>
    %22 = vector.extract_strided_slice %21 {offsets = [0, 0], sizes = [8, 4], strides = [1, 1]} : vector<64x4xf32> to vector<8x4xf32>
    %23 = vector.extract_strided_slice %21 {offsets = [8, 0], sizes = [8, 4], strides = [1, 1]} : vector<64x4xf32> to vector<8x4xf32>
    %24 = vector.extract_strided_slice %21 {offsets = [16, 0], sizes = [8, 4], strides = [1, 1]} : vector<64x4xf32> to vector<8x4xf32>
    %25 = vector.extract_strided_slice %21 {offsets = [24, 0], sizes = [8, 4], strides = [1, 1]} : vector<64x4xf32> to vector<8x4xf32>
    %26 = arith.maximumf %22, %23 : vector<8x4xf32>
    %27 = arith.maximumf %26, %24 : vector<8x4xf32>
    %28 = arith.maximumf %27, %25 : vector<8x4xf32>
    %29 = arith.subf %22, %28 : vector<8x4xf32>
    %30 = math.exp %29 : vector<8x4xf32>
    %31 = arith.subf %23, %28 : vector<8x4xf32>
    %32 = math.exp %31 : vector<8x4xf32>
    %33 = arith.subf %24, %28 : vector<8x4xf32>
    %34 = math.exp %33 : vector<8x4xf32>
    %35 = arith.subf %25, %28 : vector<8x4xf32>
    %36 = math.exp %35 : vector<8x4xf32>
    %37 = arith.addf %30, %32 : vector<8x4xf32>
    %38 = arith.addf %37, %34 : vector<8x4xf32>
    %39 = arith.addf %38, %36 : vector<8x4xf32>
    %40 = tpu.reciprocal %39 {approx = true} : vector<8x4xf32> -> vector<8x4xf32>
    %41 = arith.mulf %39, %40 : vector<8x4xf32>
    %cst_15 = arith.constant 2.000000e+00 : f32
    %42 = vector.broadcast %cst_15 : f32 to vector<8x4xf32>
    %43 = arith.subf %42, %41 : vector<8x4xf32>
    %44 = arith.mulf %40, %43 : vector<8x4xf32>
    %45 = arith.mulf %39, %44 : vector<8x4xf32>
    %cst_16 = arith.constant 2.000000e+00 : f32
    %46 = vector.broadcast %cst_16 : f32 to vector<8x4xf32>
    %47 = arith.subf %46, %45 : vector<8x4xf32>
    %48 = arith.mulf %44, %47 : vector<8x4xf32>
    %49 = arith.mulf %30, %48 : vector<8x4xf32>
    %50 = arith.mulf %32, %48 : vector<8x4xf32>
    %51 = arith.mulf %34, %48 : vector<8x4xf32>
    %52 = arith.mulf %36, %48 : vector<8x4xf32>
    %53 = vector.extract_strided_slice %21 {offsets = [32, 0], sizes = [8, 4], strides = [1, 1]} : vector<64x4xf32> to vector<8x4xf32>
    %54 = vector.extract_strided_slice %21 {offsets = [40, 0], sizes = [8, 4], strides = [1, 1]} : vector<64x4xf32> to vector<8x4xf32>
    %55 = vector.extract_strided_slice %21 {offsets = [48, 0], sizes = [8, 4], strides = [1, 1]} : vector<64x4xf32> to vector<8x4xf32>
    %56 = vector.extract_strided_slice %21 {offsets = [56, 0], sizes = [8, 4], strides = [1, 1]} : vector<64x4xf32> to vector<8x4xf32>
    %57 = arith.maximumf %53, %54 : vector<8x4xf32>
    %58 = arith.maximumf %57, %55 : vector<8x4xf32>
    %59 = arith.maximumf %58, %56 : vector<8x4xf32>
    %60 = arith.subf %53, %59 : vector<8x4xf32>
    %61 = math.exp %60 : vector<8x4xf32>
    %62 = arith.subf %54, %59 : vector<8x4xf32>
    %63 = math.exp %62 : vector<8x4xf32>
    %64 = arith.subf %55, %59 : vector<8x4xf32>
    %65 = math.exp %64 : vector<8x4xf32>
    %66 = arith.subf %56, %59 : vector<8x4xf32>
    %67 = math.exp %66 : vector<8x4xf32>
    %68 = arith.addf %61, %63 : vector<8x4xf32>
    %69 = arith.addf %68, %65 : vector<8x4xf32>
    %70 = arith.addf %69, %67 : vector<8x4xf32>
    %71 = tpu.reciprocal %70 {approx = true} : vector<8x4xf32> -> vector<8x4xf32>
    %72 = arith.mulf %70, %71 : vector<8x4xf32>
    %cst_17 = arith.constant 2.000000e+00 : f32
    %73 = vector.broadcast %cst_17 : f32 to vector<8x4xf32>
    %74 = arith.subf %73, %72 : vector<8x4xf32>
    %75 = arith.mulf %71, %74 : vector<8x4xf32>
    %76 = arith.mulf %70, %75 : vector<8x4xf32>
    %cst_18 = arith.constant 2.000000e+00 : f32
    %77 = vector.broadcast %cst_18 : f32 to vector<8x4xf32>
    %78 = arith.subf %77, %76 : vector<8x4xf32>
    %79 = arith.mulf %75, %78 : vector<8x4xf32>
    %80 = arith.mulf %61, %79 : vector<8x4xf32>
    %81 = arith.mulf %63, %79 : vector<8x4xf32>
    %82 = arith.mulf %65, %79 : vector<8x4xf32>
    %83 = arith.mulf %67, %79 : vector<8x4xf32>
    %84 = tpu.concatenate %49, %50, %51, %52, %80, %81, %82, %83 in 0 : vector<8x4xf32>, vector<8x4xf32>, vector<8x4xf32>, vector<8x4xf32>, vector<8x4xf32>, vector<8x4xf32>, vector<8x4xf32>, vector<8x4xf32> -> vector<64x4xf32>
    %c0_19 = arith.constant 0 : index
    %c0_20 = arith.constant 0 : index
    %85 = vector.load %arg7[%c0_19, %c0_20] : memref<4x32xf32, #tpu.memory_space<vmem>>, vector<4x32xf32>
    %cst_21 = arith.constant dense<0.000000e+00> : vector<64x32xf32>
    %86 = tpu.matmul %84, %85, %cst_21 {dimension_numbers = #tpu.dot_dimension_numbers<[1], [0], [0], [1], [0, 0, 1, 1], [], []>} : vector<64x4xf32>, vector<4x32xf32>, vector<64x32xf32> -> vector<64x32xf32>
    %87 = arith.mulf %86, %7 : vector<64x32xf32>
    %88 = vector.extract_strided_slice %87 {offsets = [0, 0], sizes = [8, 32], strides = [1, 1]} : vector<64x32xf32> to vector<8x32xf32>
    %89 = vector.extract_strided_slice %87 {offsets = [8, 0], sizes = [8, 32], strides = [1, 1]} : vector<64x32xf32> to vector<8x32xf32>
    %90 = arith.addf %88, %89 : vector<8x32xf32>
    %91 = vector.extract_strided_slice %87 {offsets = [16, 0], sizes = [8, 32], strides = [1, 1]} : vector<64x32xf32> to vector<8x32xf32>
    %92 = arith.addf %90, %91 : vector<8x32xf32>
    %93 = vector.extract_strided_slice %87 {offsets = [24, 0], sizes = [8, 32], strides = [1, 1]} : vector<64x32xf32> to vector<8x32xf32>
    %94 = arith.addf %92, %93 : vector<8x32xf32>
    %c0_22 = arith.constant 0 : index
    %c0_23 = arith.constant 0 : index
    %95 = vector.load %arg3[%c0_22, %c0_23] : memref<8x32xf32, #tpu.memory_space<vmem>>, vector<8x32xf32>
    %96 = arith.addf %95, %94 : vector<8x32xf32>
    %97 = vector.extract_strided_slice %87 {offsets = [32, 0], sizes = [8, 32], strides = [1, 1]} : vector<64x32xf32> to vector<8x32xf32>
    %98 = vector.extract_strided_slice %87 {offsets = [40, 0], sizes = [8, 32], strides = [1, 1]} : vector<64x32xf32> to vector<8x32xf32>
    %99 = arith.addf %97, %98 : vector<8x32xf32>
    %100 = vector.extract_strided_slice %87 {offsets = [48, 0], sizes = [8, 32], strides = [1, 1]} : vector<64x32xf32> to vector<8x32xf32>
    %101 = arith.addf %99, %100 : vector<8x32xf32>
    %102 = vector.extract_strided_slice %87 {offsets = [56, 0], sizes = [8, 32], strides = [1, 1]} : vector<64x32xf32> to vector<8x32xf32>
    %103 = arith.addf %101, %102 : vector<8x32xf32>
    %c0_24 = arith.constant 0 : index
    %c0_25 = arith.constant 0 : index
    %104 = vector.load %arg3[%c0_24, %c0_25] : memref<8x32xf32, #tpu.memory_space<vmem>>, vector<8x32xf32>
    %105 = arith.addf %104, %103 : vector<8x32xf32>
    %c0_26 = arith.constant 0 : index
    %c0_27 = arith.constant 0 : index
    %106 = vector.load %arg10[%c0_26, %c0_27] : memref<8x32xf32, #tpu.memory_space<vmem>>, vector<8x32xf32>
    %c0_28 = arith.constant 0 : index
    %c0_29 = arith.constant 0 : index
    %107 = vector.load %arg11[%c0_28, %c0_29] : memref<8x32xf32, #tpu.memory_space<vmem>>, vector<8x32xf32>
    %108 = arith.addf %96, %105 : vector<8x32xf32>
    %cst_30 = arith.constant 5.000000e-01 : f32
    %109 = vector.broadcast %cst_30 : f32 to vector<8x32xf32>
    %110 = arith.mulf %108, %109 : vector<8x32xf32>
    %111 = arith.subf %96, %110 : vector<8x32xf32>
    %112 = arith.subf %96, %110 : vector<8x32xf32>
    %113 = arith.mulf %111, %112 : vector<8x32xf32>
    %114 = arith.subf %105, %110 : vector<8x32xf32>
    %115 = arith.subf %105, %110 : vector<8x32xf32>
    %116 = arith.mulf %114, %115 : vector<8x32xf32>
    %117 = arith.addf %113, %116 : vector<8x32xf32>
    %cst_31 = arith.constant 5.000000e-01 : f32
    %118 = vector.broadcast %cst_31 : f32 to vector<8x32xf32>
    %119 = arith.mulf %117, %118 : vector<8x32xf32>
    %cst_32 = arith.constant 9.99999974E-6 : f32
    %120 = vector.broadcast %cst_32 : f32 to vector<8x32xf32>
    %121 = arith.addf %119, %120 : vector<8x32xf32>
    %122 = math.rsqrt %121 : vector<8x32xf32>
    %123 = arith.subf %96, %110 : vector<8x32xf32>
    %124 = arith.mulf %123, %122 : vector<8x32xf32>
    %125 = arith.mulf %124, %106 : vector<8x32xf32>
    %126 = arith.addf %125, %107 : vector<8x32xf32>
    %127 = arith.subf %105, %110 : vector<8x32xf32>
    %128 = arith.mulf %127, %122 : vector<8x32xf32>
    %129 = arith.mulf %128, %106 : vector<8x32xf32>
    %130 = arith.addf %129, %107 : vector<8x32xf32>
    %131 = tpu.concatenate %126, %130 in 0 : vector<8x32xf32>, vector<8x32xf32> -> vector<16x32xf32>
    %c0_33 = arith.constant 0 : index
    %c0_34 = arith.constant 0 : index
    %132 = vector.load %arg8[%c0_33, %c0_34] : memref<32x32xf32, #tpu.memory_space<vmem>>, vector<32x32xf32>
    %cst_35 = arith.constant dense<0.000000e+00> : vector<16x32xf32>
    %133 = tpu.matmul %131, %132, %cst_35 {dimension_numbers = #tpu.dot_dimension_numbers<[1], [0], [0], [1], [0, 0, 1, 1], [], []>} : vector<16x32xf32>, vector<32x32xf32>, vector<16x32xf32> -> vector<16x32xf32>
    %c0_36 = arith.constant 0 : index
    %c0_37 = arith.constant 0 : index
    %134 = vector.load %arg9[%c0_36, %c0_37] : memref<1x32xf32, #tpu.memory_space<vmem>>, vector<1x32xf32>
    %135 = vector.broadcast %134 : vector<1x32xf32> to vector<16x32xf32>
    %136 = arith.addf %133, %135 : vector<16x32xf32>
    %cst_38 = arith.constant 0.000000e+00 : f32
    %137 = vector.broadcast %cst_38 : f32 to vector<16x32xf32>
    %138 = arith.maximumf %136, %137 : vector<16x32xf32>
    %139 = arith.addf %131, %138 : vector<16x32xf32>
    %140 = vector.extract_strided_slice %139 {offsets = [0, 0], sizes = [8, 32], strides = [1, 1]} : vector<16x32xf32> to vector<8x32xf32>
    %141 = vector.extract_strided_slice %139 {offsets = [8, 0], sizes = [8, 32], strides = [1, 1]} : vector<16x32xf32> to vector<8x32xf32>
    %c0_39 = arith.constant 0 : index
    %c0_40 = arith.constant 0 : index
    %142 = vector.load %arg12[%c0_39, %c0_40] : memref<8x32xf32, #tpu.memory_space<vmem>>, vector<8x32xf32>
    %c0_41 = arith.constant 0 : index
    %c0_42 = arith.constant 0 : index
    %143 = vector.load %arg13[%c0_41, %c0_42] : memref<8x32xf32, #tpu.memory_space<vmem>>, vector<8x32xf32>
    %144 = arith.addf %140, %141 : vector<8x32xf32>
    %cst_43 = arith.constant 5.000000e-01 : f32
    %145 = vector.broadcast %cst_43 : f32 to vector<8x32xf32>
    %146 = arith.mulf %144, %145 : vector<8x32xf32>
    %147 = arith.subf %140, %146 : vector<8x32xf32>
    %148 = arith.subf %140, %146 : vector<8x32xf32>
    %149 = arith.mulf %147, %148 : vector<8x32xf32>
    %150 = arith.subf %141, %146 : vector<8x32xf32>
    %151 = arith.subf %141, %146 : vector<8x32xf32>
    %152 = arith.mulf %150, %151 : vector<8x32xf32>
    %153 = arith.addf %149, %152 : vector<8x32xf32>
    %cst_44 = arith.constant 5.000000e-01 : f32
    %154 = vector.broadcast %cst_44 : f32 to vector<8x32xf32>
    %155 = arith.mulf %153, %154 : vector<8x32xf32>
    %cst_45 = arith.constant 9.99999974E-6 : f32
    %156 = vector.broadcast %cst_45 : f32 to vector<8x32xf32>
    %157 = arith.addf %155, %156 : vector<8x32xf32>
    %158 = math.rsqrt %157 : vector<8x32xf32>
    %159 = arith.subf %140, %146 : vector<8x32xf32>
    %160 = arith.mulf %159, %158 : vector<8x32xf32>
    %161 = arith.mulf %160, %142 : vector<8x32xf32>
    %162 = arith.addf %161, %143 : vector<8x32xf32>
    %163 = arith.subf %141, %146 : vector<8x32xf32>
    %164 = arith.mulf %163, %158 : vector<8x32xf32>
    %165 = arith.mulf %164, %142 : vector<8x32xf32>
    %166 = arith.addf %165, %143 : vector<8x32xf32>
    %167 = tpu.concatenate %162, %166 in 0 : vector<8x32xf32>, vector<8x32xf32> -> vector<16x32xf32>
    %c0_46 = arith.constant 0 : index
    %c0_47 = arith.constant 0 : index
    %168 = vector.load %arg14[%c0_46, %c0_47] : memref<16x32xf32, #tpu.memory_space<vmem>>, vector<16x32xf32>
    tpu.vector_store %arg14[%c0_46, %c0_47], %167 {strides = array<i32>} : memref<16x32xf32, #tpu.memory_space<vmem>>, vector<16x32xf32>,
    return
  }
}

</mosaic_0001>

<bundles_post_ra>
// kernel: tpu_custom_call.1
= control target key start
LH: loop header
LB: loop body
LE: loop exit
PB: predicated region body
PF: predicated region fallthrough
CT: control target
= control target key end

     0   :  { %vm67_vm0 = vcmask 261120   ;;  %s1202_s0 = inlined_call_operand.vmem [shape: f32[64,32], index: 0, kind: input, shape index: {}]   ;;  %s1203_s1 = inlined_call_operand.vmem [shape: f32[32,64], index: 1, kind: input, shape index: {}]   ;;  %s1204_s2 = inlined_call_operand.vmem [shape: f32[1,64], index: 2, kind: input, shape index: {}]   ;;  %s1205_s3 = inlined_call_operand.vmem [shape: f32[8,32], index: 3, kind: input, shape index: {}]   ;;  %s1206_s4 = inlined_call_operand.vmem [shape: f32[8,32], index: 4, kind: input, shape index: {}]   ;;  %s1207_s5 = inlined_call_operand.vmem [shape: f32[8,32], index: 5, kind: input, shape index: {}]   ;;  %s1208_s6 = inlined_call_operand.vmem [shape: f32[32,4], index: 6, kind: input, shape index: {}]   ;;  %s1209_s7 = inlined_call_operand.vmem [shape: f32[4,32], index: 7, kind: input, shape index: {}]   ;;  %s1210_s8 = inlined_call_operand.vmem [shape: f32[32,32], index: 8, kind: input, shape index: {}]   ;;  %s1211_s9 = inlined_call_operand.vmem [shape: f32[1,32], index: 9, kind: input, shape index: {}]   ;;  %s1212_s10 = inlined_call_operand.vmem [shape: f32[8,32], index: 10, kind: input, shape index: {}]   ;;  %s1213_s11 = inlined_call_operand.vmem [shape: f32[8,32], index: 11, kind: input, shape index: {}]   ;;  %s1214_s12 = inlined_call_operand.vmem [shape: f32[8,32], index: 12, kind: input, shape index: {}]   ;;  %s1215_s13 = inlined_call_operand.vmem [shape: f32[8,32], index: 13, kind: input, shape index: {}]   ;;  %s1216_s14 = inlined_call_operand.hbm [shape: f32[16,32], index: 14, kind: output, shape index: {}]  }
   0x1   :  { %v56_v0 = vld [vmem:[%s1203_s1] sm:$0xff]  ;;  %v57_v1 = vld [vmem:[%s1203_s1 + $0x8] sm:$0xff]  ;;  %v58_v2 = vld [vmem:[%s1203_s1 + $0x10] sm:$0xff] }
   0x2   :  { %v897_v3 = vpack.c.bf16 %v57_v1, %v56_v0  ;;  %v59_v4 = vld [vmem:[%s1203_s1 + $0x18] sm:$0xff]  ;;  %v48_v5 = vld [vmem:[%s1202_s0] sm:$0xff] }
   0x3   :  { %v901_v6 = vpack.c.bf16 %v59_v4, %v58_v2  ;;  %840 = vmatprep.mubr.msk.f32.mxu0 %vm67_vm0, %v48_v5 }
   0x4   :  { %898 = vmatprep.subr.bf16.mxu0 %v897_v3 }
   0x5   :  { %900 = vmatpush3.bf16.msra.mxu0 %v897_v3 }
   0x6   :  { %19 = vsyncpa [#allocation3], 0  ;;  %902 = vmatprep.subr.bf16.mxu0 %v901_v6  ;;  %v49_v7 = vld [vmem:[%s1202_s0 + $0x8] sm:$0xff]  ;;  %v50_v8 = vld [vmem:[%s1202_s0 + $0x10] sm:$0xff]  ;;  %s973_s30 = smov 96   ;;  %vm457_vm1 = vcmask 1043456  }
   0x7   :  { %v51_v9 = vld [vmem:[%s1202_s0 + $0x18] sm:$0xff]  ;;  %v52_v10 = vld [vmem:[%s1202_s0 + $0x20] sm:$0xff]  ;;  %v53_v11 = vld [vmem:[%s1202_s0 + $0x28] sm:$0xff]  ;;  %vm432_vm2 = vcmask 31744   ;;  %s974_s27 = smov [#allocation2]  }
   0x8   :  { %v54_v12 = vld [vmem:[%s1202_s0 + $0x30] sm:$0xff]  ;;  %v55_v13 = vld [vmem:[%s1202_s0 + $0x38] sm:$0xff]  ;;  %v232_v14 = vld [vmem:[%s1208_s6] sm:$0xff]  ;;  %s753_s28 = sshll.u32 %s974_s27, 4  ;;  %s754_s28 = int_to_ptr.vmem [resolvable:$true] %s753_s28 }
   0x9   :  { %904 = vmatpush3.bf16.msra.mxu0 %v901_v6  ;;  %v233_v15 = vld [vmem:[%s1208_s6 + $0x8] sm:$0xff]  ;;  %v234_v17 = vld [vmem:[%s1208_s6 + $0x10] sm:$0xff]  ;;  %v235_v18 = vld [vmem:[%s1208_s6 + $0x18] sm:$0xff]  ;;  %s949_s29 = scalar_lea.vmem %s754_s28, 256  ;;  %p954_p1 = scmp.lt.s32.totalorder %s754_s28, %s754_s28 }
   0xa   :  { %v905_v16 = vpack.c.bf16 %v233_v15, %v232_v14  ;;  %v909_v19 = vpack.c.bf16 %v235_v18, %v234_v17  ;;  %v764_v20 = vld [vmem:[%s1204_s2] ss:$0 sm:$0xff]  ;;  %p950_p0 = scmp.ne.s32.totalorder %s754_s28, %s949_s29  ;;  %p955_p2 = scmp.lt.s32.totalorder %s949_s29, %s949_s29 }
   0xb   :  { %v1114_v22 = vld [vmem:[%s1205_s3] sm:$0xff] }
   0xc   :  { %841 = vmatmul.mubr.msk.f32.vlgmr.msra.gmra.mrb[0].mxu0 %vm67_vm0, %v49_v7  ;;  %906 = vmatprep.subr.bf16.mxu1 %v905_v16  ;;  %v198_v27 = vld [vmem:[%s1206_s4] sm:$0xff]  ;;  %p956_p3 = por %p955_p2, %p954_p1 }
   0xd   :  { %843 = vmatprep.mubr.msk.f32.mxu0 %vm67_vm0, %v50_v8  ;;  %908 = vmatpush3.bf16.msra.mxu1 %v905_v16  ;;  %v199_v35 = vld [vmem:[%s1207_s5] sm:$0xff] }
   0xe   :  { %910 = vmatprep.subr.bf16.mxu1 %v909_v19  ;;  %v431_v8 = vld [vmem:[%s1209_s7] sm:$0xf]  ;;  %p957_p4 = pnand %p956_p3, %p950_p0 }
   0xf   :  { %872 = vmatprep.subr.msk.mxu0 %vm457_vm1, %v431_v8 }
  0x10   :  { %844 = vmatmul.mubr.msk.f32.gmra.mrb[2].mxu0 %vm67_vm0, %v51_v9 }
  0x11   :  { %846 = vmatprep.mubr.msk.f32.mxu0 %vm67_vm0, %v52_v10  ;;  %912 = vmatpush3.bf16.msra.mxu1 %v909_v19 }
  0x12   :  { %873 = vmatpush3.msk.msra.mxu0 %vm457_vm1, %v431_v8 }
  0x14   :  { %847 = vmatmul.mubr.msk.f32.gmra.mrb[4].mxu0 %vm67_vm0, %v53_v11 }
  0x15   :  { %849 = vmatprep.mubr.msk.f32.mxu0 %vm67_vm0, %v54_v12 }
  0x18   :  { %850 = vmatmul.mubr.msk.f32.gmra.mrb[6].mxu0 %vm67_vm0, %v55_v13 }
  0xdf   :  { %v842_v21 = vpop.f32.mrb[0].mxu0 }
  0xe0   :  { %v164_v23 = vadd.f32 %v842_v21, %v764_v20  ;;  %v158_v24 = vpop.f32.mrb[1].mxu0 }
  0xe1   :  { %v159_v25 = vadd.f32 %v764_v20, %v158_v24 }
  0xe2   :  { %v201_v26 = vsub.f32 %v164_v23, %v1114_v22  ;;  %576 = vrot.lane.b32.xlu0 %v164_v23, %s973_s30 }
  0xe3   :  { %v200_v28 = vsub.f32 %v159_v25, %v1114_v22  ;;  %v845_v29 = vpop.f32.mrb[2].mxu0 }
  0xe4   :  { %v209_v30 = vmul.f32 %v201_v26, %v201_v26  ;;  %v174_v31 = vadd.f32 %v845_v29, %v764_v20  ;;  %v168_v32 = vpop.f32.mrb[3].mxu0 }
  0xe5   :  { %v208_v33 = vmul.f32 %v200_v28, %v200_v28  ;;  %v169_v34 = vadd.f32 %v764_v20, %v168_v32 }
  0xe6   :  { %v217_v36 = vmul.f32 %v209_v30, %v198_v27  ;;  %v203_v37 = vsub.f32 %v174_v31, %v1114_v22  ;;  %574 = vrot.lane.b32.xlu0 %v159_v25, %s973_s30 }
  0xe7   :  { %v202_v38 = vsub.f32 %v169_v34, %v1114_v22  ;;  %v848_v39 = vpop.f32.mrb[4].mxu0  ;;  %v216_v40 = vmul.f32 %v208_v33, %v198_v27 }
  0xe8   :  { %v211_v41 = vmul.f32 %v203_v37, %v203_v37  ;;  %v184_v42 = vadd.f32 %v848_v39, %v764_v20  ;;  %v178_v43 = vpop.f32.mrb[5].mxu0  ;;  %v225_v47 = vadd.f32 %v217_v36, %v199_v35 }
  0xe9   :  { %v210_v44 = vmul.f32 %v202_v38, %v202_v38  ;;  %v179_v45 = vadd.f32 %v764_v20, %v178_v43  ;;  %v224_v46 = vadd.f32 %v216_v40, %v199_v35 }
  0xea   :  { %v219_v48 = vmul.f32 %v211_v41, %v198_v27  ;;  %v205_v49 = vsub.f32 %v184_v42, %v1114_v22  ;;  %584 = vrot.lane.b32.xlu1 %v184_v42, %s973_s30  ;;  %578 = vrot.lane.b32.xlu0 %v169_v34, %s973_s30 }
  0xeb   :  { %v218_v50 = vmul.f32 %v210_v44, %v198_v27  ;;  %v204_v51 = vsub.f32 %v179_v45, %v1114_v22  ;;  %v851_v52 = vpop.f32.mrb[6].mxu0  ;;  %860 = vmatprep.mubr.msk.f32.mxu1 %vm67_vm0, %v224_v46 }
  0xec   :  { %v213_v53 = vmul.f32 %v205_v49, %v205_v49  ;;  %v194_v54 = vadd.f32 %v851_v52, %v764_v20  ;;  %v188_v55 = vpop.f32.mrb[7].mxu0  ;;  %861 = vmatmul.mubr.msk.f32.vlgmr.msra.gmra.mrb[0].mxu1 %vm67_vm0, %v225_v47  ;;  %v227_v59 = vadd.f32 %v219_v48, %v199_v35 }
  0xed   :  { %v226_v56 = vadd.f32 %v218_v50, %v199_v35  ;;  %v212_v57 = vmul.f32 %v204_v51, %v204_v51  ;;  %v189_v58 = vadd.f32 %v764_v20, %v188_v55 }
  0xee   :  { %v221_v60 = vmul.f32 %v213_v53, %v198_v27  ;;  %v207_v61 = vsub.f32 %v194_v54, %v1114_v22  ;;  %582 = vrot.lane.b32.xlu1 %v179_v45, %s973_s30  ;;  %580 = vrot.lane.b32.xlu0 %v174_v31, %s973_s30 }
  0xef   :  { %v220_v62 = vmul.f32 %v212_v57, %v198_v27  ;;  %v206_v63 = vsub.f32 %v189_v58, %v1114_v22  ;;  %863 = vmatprep.mubr.msk.f32.mxu1 %vm67_vm0, %v226_v56 }
  0xf0   :  { %v215_v0 = vmul.f32 %v207_v61, %v207_v61  ;;  %864 = vmatmul.mubr.msk.f32.gmra.mrb[2].mxu1 %vm67_vm0, %v227_v59  ;;  %v229_v3 = vadd.f32 %v221_v60, %v199_v35 }
  0xf1   :  { %v228_v1 = vadd.f32 %v220_v62, %v199_v35  ;;  %v214_v2 = vmul.f32 %v206_v63, %v206_v63 }
  0xf2   :  { %v223_v4 = vmul.f32 %v215_v0, %v198_v27  ;;  %586 = vrot.lane.b32.xlu1 %v189_v58, %s973_s30 }
  0xf3   :  { %v222_v5 = vmul.f32 %v214_v2, %v198_v27  ;;  %866 = vmatprep.mubr.msk.f32.mxu1 %vm67_vm0, %v228_v1 }
  0xf4   :  { %867 = vmatmul.mubr.msk.f32.gmra.mrb[4].mxu1 %vm67_vm0, %v229_v3  ;;  %v231_v7 = vadd.f32 %v223_v4, %v199_v35 }
  0xf5   :  { %v230_v6 = vadd.f32 %v222_v5, %v199_v35 }
  0xf6   :  { %588 = vrot.lane.b32.xlu1 %v194_v54, %s973_s30 }
  0xf7   :  { %869 = vmatprep.mubr.msk.f32.mxu1 %vm67_vm0, %v230_v6 }
  0xf8   :  { %870 = vmatmul.mubr.msk.f32.gmra.mrb[6].mxu1 %vm67_vm0, %v231_v7 }
 0x1bf   :  { %v862_v9 = vpop.f32.mrb[0].mxu1 }
 0x1c0   :  { %v366_v10 = vmul.f32 0.17677669, %v862_v9  ;;  %v326_v11 = vpop.f32.mrb[1].mxu1 }
 0x1c1   :  { %v365_v12 = vmul.f32 0.17677669, %v326_v11 }
 0x1c3   :  { %v373_v13 = vmax.f32 %v365_v12, %v366_v10  ;;  %v865_v14 = vpop.f32.mrb[2].mxu1 }
 0x1c4   :  { %v336_v15 = vpop.f32.mrb[3].mxu1  ;;  %v368_v17 = vmul.f32 0.17677669, %v865_v14 }
 0x1c5   :  { %v367_v16 = vmul.f32 0.17677669, %v336_v15 }
 0x1c7   :  { %v374_v18 = vmax.f32 %v373_v13, %v367_v16  ;;  %v868_v19 = vpop.f32.mrb[4].mxu1 }
 0x1c8   :  { %v370_v20 = vmul.f32 0.17677669, %v868_v19  ;;  %v346_v21 = vpop.f32.mrb[5].mxu1 }
 0x1c9   :  { %v375_v23 = vmax.f32 %v374_v18, %v368_v17  ;;  %v369_v24 = vmul.f32 0.17677669, %v346_v21  ;;  %v633_v21 = vld [vmem:[%s1210_s8 + $0x8] sm:$0xff] }
 0x1cb   :  { %v376_v25 = vsub.f32 %v365_v12, %v375_v23  ;;  %v379_v26 = vsub.f32 %v366_v10, %v375_v23  ;;  %v382_v27 = vsub.f32 %v367_v16, %v375_v23  ;;  %v385_v28 = vsub.f32 %v368_v17, %v375_v23  ;;  %v871_v29 = vpop.f32.mrb[6].mxu1 }
 0x1cc   :  { %v402_v30 = vmax.f32 %v369_v24, %v370_v20  ;;  %v356_v31 = vpop.f32.mrb[7].mxu1  ;;  %v372_v37 = vmul.f32 0.17677669, %v871_v29  ;;  %v585_v29 = vpop.permute.xlu1 %584 }
 0x1cd   :  { %v377_v32 = vmul.f32 1.442695, %v376_v25  ;;  %v380_v33 = vmul.f32 1.442695, %v379_v26  ;;  %v383_v34 = vmul.f32 1.442695, %v382_v27  ;;  %v577_v27 = vpop.permute.xlu0 %576 }
 0x1ce   :  { %v371_v35 = vmul.f32 0.17677669, %v356_v31  ;;  %v386_v36 = vmul.f32 1.442695, %v385_v28  ;;  %v635_v25 = vld [vmem:[%s1210_s8 + $0x18] sm:$0xff] }
 0x1cf   :  { %925 = vpow2.f32 %v377_v32 }
 0x1d0   :  { %927 = vpow2.f32 %v380_v33  ;;  %v403_v38 = vmax.f32 %v402_v30, %v371_v35 }
 0x1d1   :  { %929 = vpow2.f32 %v383_v34  ;;  %v575_v28 = vpop.permute.xlu0 %574 }
 0x1d2   :  { %v404_v39 = vmax.f32 %v403_v38, %v372_v37  ;;  %931 = vpow2.f32 %v386_v36 }
 0x1d4   :  { %v405_v40 = vsub.f32 %v369_v24, %v404_v39  ;;  %v408_v41 = vsub.f32 %v370_v20, %v404_v39  ;;  %v411_v42 = vsub.f32 %v371_v35, %v404_v39  ;;  %v414_v43 = vsub.f32 %v372_v37, %v404_v39  ;;  %v632_v20 = vld [vmem:[%s1210_s8] sm:$0xff]  ;;  %v634_v24 = vld [vmem:[%s1210_s8 + $0x10] sm:$0xff]  ;;  %v583_v35 = vpop.permute.xlu1 %582 }
 0x1d5   :  { %v913_v23 = vpack.c.bf16 %v633_v21, %v632_v20  ;;  %v917_v26 = vpack.c.bf16 %v635_v25, %v634_v24  ;;  %v579_v31 = vpop.permute.xlu0 %578 }
 0x1d6   :  { %v406_v44 = vmul.f32 1.442695, %v405_v40  ;;  %v409_v45 = vmul.f32 1.442695, %v408_v41  ;;  %v412_v46 = vmul.f32 1.442695, %v411_v42 }
 0x1d7   :  { %v415_v48 = vmul.f32 1.442695, %v414_v43  ;;  %914 = vmatprep.subr.bf16.mxu1 %v913_v23 }
 0x1d8   :  { %933 = vpow2.f32 %v406_v44  ;;  %916 = vmatpush3.bf16.msra.mxu1 %v913_v23  ;;  %v587_v44 = vpop.permute.xlu1 %586 }
 0x1d9   :  { %v926_v47 = vpop.eup %925  ;;  %935 = vpow2.f32 %v409_v45  ;;  %918 = vmatprep.subr.bf16.mxu1 %v917_v26  ;;  %v581_v40 = vpop.permute.xlu0 %580 }
 0x1da   :  { %v928_v49 = vpop.eup %927  ;;  %937 = vpow2.f32 %v412_v46 }
 0x1db   :  { %v388_v50 = vadd.f32 %v928_v49, %v926_v47  ;;  %v930_v51 = vpop.eup %929  ;;  %939 = vpow2.f32 %v415_v48 }
 0x1dc   :  { %v932_v52 = vpop.eup %931  ;;  %920 = vmatpush3.bf16.msra.mxu1 %v917_v26 }
 0x1dd   :  { %v389_v53 = vadd.f32 %v930_v51, %v388_v50 }
 0x1df   :  { %v390_v54 = vadd.f32 %v932_v52, %v389_v53  ;;  %v589_v53 = vpop.permute.xlu1 %588 }
 0x1e1   :  { %941 = vrcp.f32 %v390_v54 }
 0x1e2   :  { %v934_v55 = vpop.eup %933 }
 0x1e3   :  { %v936_v56 = vpop.eup %935 }
 0x1e4   :  { %v417_v57 = vadd.f32 %v936_v56, %v934_v55  ;;  %v938_v58 = vpop.eup %937 }
 0x1e5   :  { %v940_v60 = vpop.eup %939 }
 0x1e6   :  { %v418_v59 = vadd.f32 %v938_v58, %v417_v57 }
 0x1e8   :  { %v419_v61 = vadd.f32 %v940_v60, %v418_v59 }
 0x1ea   :  { %943 = vrcp.f32 %v419_v61 }
 0x1eb   :  { %v942_v62 = vpop.eup %941 }
 0x1ec   :  { %v392_v63 = vmul.f32 %v942_v62, %v390_v54 }
 0x1ee   :  { %v393_v0 = vsub.f32 2.0, %v392_v63 }
 0x1f0   :  { %v394_v1 = vmul.f32 %v942_v62, %v393_v0 }
 0x1f2   :  { %v395_v2 = vmul.f32 %v394_v1, %v390_v54 }
 0x1f4   :  { %v944_v3 = vpop.eup %943  ;;  %v396_v4 = vsub.f32 2.0, %v395_v2 }
 0x1f5   :  { %v421_v5 = vmul.f32 %v944_v3, %v419_v61 }
 0x1f6   :  { %v397_v6 = vmul.f32 %v396_v4, %v394_v1 }
 0x1f7   :  { %v422_v7 = vsub.f32 2.0, %v421_v5  ;;  %v614_v5 = vld [vmem:[%s1212_s10] sm:$0xff] }
 0x1f8   :  { %v398_v8 = vmul.f32 %v926_v47, %v397_v6  ;;  %v399_v9 = vmul.f32 %v928_v49, %v397_v6  ;;  %v400_v10 = vmul.f32 %v930_v51, %v397_v6  ;;  %v401_v11 = vmul.f32 %v932_v52, %v397_v6 }
 0x1f9   :  { %v423_v12 = vmul.f32 %v944_v3, %v422_v7 }
 0x1fa   :  { %874 = vmatprep.mubr.msk.f32.mxu0 %vm432_vm2, %v398_v8 }
 0x1fb   :  { %875 = vmatmul.mubr.msk.f32.vlgmr.msra.gmra.mrb[8].mxu0 %vm432_vm2, %v399_v9  ;;  %v424_v13 = vmul.f32 %v423_v12, %v419_v61 }
 0x1fc   :  { %877 = vmatprep.mubr.msk.f32.mxu0 %vm432_vm2, %v400_v10 }
 0x1fd   :  { %v425_v14 = vsub.f32 2.0, %v424_v13 }
 0x1ff   :  { %878 = vmatmul.mubr.msk.f32.gmra.mrb[10].mxu0 %vm432_vm2, %v401_v11  ;;  %v426_v15 = vmul.f32 %v425_v14, %v423_v12  ;;  %v790_v12 = vld [vmem:[%s1211_s9] ss:$0 sm:$0xff] }
 0x201   :  { %v427_v16 = vmul.f32 %v934_v55, %v426_v15  ;;  %v428_v17 = vmul.f32 %v936_v56, %v426_v15  ;;  %v429_v18 = vmul.f32 %v938_v58, %v426_v15  ;;  %v430_v19 = vmul.f32 %v940_v60, %v426_v15 }
 0x203   :  { %880 = vmatprep.mubr.msk.f32.mxu0 %vm432_vm2, %v427_v16 }
 0x204   :  { %881 = vmatmul.mubr.msk.f32.gmra.mrb[12].mxu0 %vm432_vm2, %v428_v17 }
 0x205   :  { %883 = vmatprep.mubr.msk.f32.mxu0 %vm432_vm2, %v429_v18 }
 0x208   :  { %884 = vmatmul.mubr.msk.f32.gmra.mrb[14].mxu0 %vm432_vm2, %v430_v19 }
 0x2ce   :  { %v876_v30 = vpop.f32.mrb[8].mxu0 }
 0x2cf   :  { %v599_v32 = vmul.f32 %v876_v30, %v577_v27  ;;  %v527_v33 = vpop.f32.mrb[9].mxu0 }
 0x2d0   :  { %v598_v34 = vmul.f32 %v575_v28, %v527_v33 }
 0x2d2   :  { %v606_v36 = vadd.f32 %v599_v32, %v598_v34  ;;  %v879_v37 = vpop.f32.mrb[10].mxu0  ;;  %v728_v32 = vld [vmem:[%s1214_s12] sm:$0xff] }
 0x2d3   :  { %v537_v38 = vpop.f32.mrb[11].mxu0  ;;  %v601_v41 = vmul.f32 %v879_v37, %v581_v40 }
 0x2d4   :  { %v600_v39 = vmul.f32 %v579_v31, %v537_v38 }
 0x2d6   :  { %v607_v42 = vadd.f32 %v606_v36, %v600_v39 }
 0x2d7   :  { %v882_v43 = vpop.f32.mrb[12].mxu0 }
 0x2d8   :  { %v608_v45 = vadd.f32 %v607_v42, %v601_v41  ;;  %v603_v46 = vmul.f32 %v882_v43, %v585_v29  ;;  %v547_v47 = vpop.f32.mrb[13].mxu0 }
 0x2d9   :  { %v602_v48 = vmul.f32 %v583_v35, %v547_v47  ;;  %v729_v35 = vld [vmem:[%s1215_s13] sm:$0xff] }
 0x2da   :  { %v609_v57 = vadd.f32 %v608_v45, %v1114_v22 }
 0x2db   :  { %v610_v49 = vadd.f32 %v603_v46, %v602_v48  ;;  %v885_v50 = vpop.f32.mrb[14].mxu0 }
 0x2dc   :  { %v557_v51 = vpop.f32.mrb[15].mxu0  ;;  %v605_v54 = vmul.f32 %v885_v50, %v589_v53 }
 0x2dd   :  { %v604_v52 = vmul.f32 %v587_v44, %v557_v51 }
 0x2df   :  { %v611_v55 = vadd.f32 %v610_v49, %v604_v52 }
 0x2e1   :  { %v612_v56 = vadd.f32 %v611_v55, %v605_v54 }
 0x2e3   :  { %v613_v58 = vadd.f32 %v612_v56, %v1114_v22  ;;  %v615_v22 = vld [vmem:[%s1213_s11] sm:$0xff] }
 0x2e5   :  { %v616_v59 = vadd.f32 %v613_v58, %v609_v57 }
 0x2e7   :  { %v617_v60 = vmul.f32 0.5, %v616_v59 }
 0x2e9   :  { %v618_v61 = vsub.f32 %v609_v57, %v617_v60  ;;  %v620_v62 = vsub.f32 %v613_v58, %v617_v60 }
 0x2eb   :  { %v619_v63 = vmul.f32 %v618_v61, %v618_v61  ;;  %v621_v0 = vmul.f32 %v620_v62, %v620_v62 }
 0x2ed   :  { %v622_v1 = vadd.f32 %v621_v0, %v619_v63 }
 0x2ef   :  { %v623_v2 = vmul.f32 0.5, %v622_v1 }
 0x2f1   :  { %v624_v3 = vadd.f32 1e-05, %v623_v2 }
 0x2f3   :  { %945 = vrsqrt.f32 %v624_v3 }
 0x2fd   :  { %v946_v4 = vpop.eup %945 }
 0x2fe   :  { %v629_v6 = vmul.f32 %v946_v4, %v620_v62  ;;  %v626_v7 = vmul.f32 %v946_v4, %v618_v61 }
 0x300   :  { %v627_v8 = vmul.f32 %v626_v7, %v614_v5  ;;  %v630_v9 = vmul.f32 %v629_v6, %v614_v5 }
 0x302   :  { %v628_v10 = vadd.f32 %v627_v8, %v615_v22  ;;  %v631_v11 = vadd.f32 %v630_v9, %v615_v22 }
 0x304   :  { %894 = vmatprep.mubr.msk.f32.mxu1 %vm67_vm0, %v628_v10 }
 0x305   :  { %895 = vmatmul.mubr.msk.f32.vlgmr.msra.gmra.mrb[8].mxu1 %vm67_vm0, %v631_v11 }
 0x3d8   :  { %v896_v13 = vpop.f32.mrb[8].mxu1 }
 0x3d9   :  { %v721_v14 = vadd.f32 %v896_v13, %v790_v12  ;;  %v715_v15 = vpop.f32.mrb[9].mxu1 }
 0x3da   :  { %v716_v16 = vadd.f32 %v790_v12, %v715_v15 }
 0x3db   :  { %v725_v17 = vmax.f32 %v721_v14, 0.0 }
 0x3dc   :  { %v724_v18 = vmax.f32 %v716_v16, 0.0 }
 0x3dd   :  { %v727_v19 = vadd.f32 %v725_v17, %v631_v11 }
 0x3de   :  { %v726_v20 = vadd.f32 %v724_v18, %v628_v10 }
 0x3e0   :  { %v730_v21 = vadd.f32 %v727_v19, %v726_v20 }
 0x3e2   :  { %v731_v23 = vmul.f32 0.5, %v730_v21 }
 0x3e4   :  { %v732_v24 = vsub.f32 %v726_v20, %v731_v23  ;;  %v734_v25 = vsub.f32 %v727_v19, %v731_v23 }
 0x3e6   :  { %v733_v26 = vmul.f32 %v732_v24, %v732_v24  ;;  %v735_v27 = vmul.f32 %v734_v25, %v734_v25 }
 0x3e8   :  { %v736_v28 = vadd.f32 %v735_v27, %v733_v26 }
 0x3ea   :  { %v737_v29 = vmul.f32 0.5, %v736_v28 }
 0x3ec   :  { %v738_v30 = vadd.f32 1e-05, %v737_v29 }
 0x3ee   :  { %947 = vrsqrt.f32 %v738_v30 }
 0x3f8   :  { %v948_v31 = vpop.eup %947 }
 0x3f9   :  { %v740_v33 = vmul.f32 %v948_v31, %v732_v24  ;;  %v743_v34 = vmul.f32 %v948_v31, %v734_v25 }
 0x3fb   :  { %v741_v36 = vmul.f32 %v740_v33, %v728_v32  ;;  %v744_v37 = vmul.f32 %v743_v34, %v728_v32 }
 0x3fd   :  { %v742_v38 = vadd.f32 %v741_v36, %v729_v35  ;;  %v745_v39 = vadd.f32 %v744_v37, %v729_v35 }
 0x3ff   :  { %746 = vst.msk [vmem:[#allocation2] sm:$0xff] %vm67_vm0, %v742_v38  ;;  %747 = vst.msk [vmem:[#allocation2 + $0x8] sm:$0xff] %vm67_vm0, %v745_v39 }
 0x400   :  { %960 = shalt.err (!%p957_p4)
}
 0x401   :  { %s961_s30 = scalar_lea.hbm %s1216_s14, 256 }
 0x402   :  { %p962_p5 = scmp.ne.s32.totalorder %s1216_s14, %s961_s30  ;;  %p965_p6 = scmp.lt.u32.totalorder %s961_s30, %s1216_s14 }
 0x404   :  { %p967_p7 = pnand %p965_p6, %p962_p5 }
 0x406   :  { %970 = shalt.err (!%p967_p7)
}
 0x407   :  { %s975_s4 = smov 128   ;;  %s976_s5 = smov 8  }
 0x408   :  { %759 = dma.vmem_to_hbm [thread:$0]  %s754_s28, 256, %s1216_s14, [#allocation3], %s975_s4, %s975_s4, %s976_s5  }
 0x409   :  { %971 = dma.done.wait [#allocation3], 256  }
 0x40a   :  { %972 = vsyncadd [#allocation3], 4294967040 }
 0x40b   :  { %763 = vsyncpa [#allocation3], 1 }

</bundles_post_ra>
